<compile_context>
chip_gen: v7x
topology: tpu7x:2x2x1
jax: 0.10.0
libtpu: 0.0.40
codegen_flags: <defaults>
</compile_context>

<pallas_src>
import functools

import jax
import jax.numpy as jnp
from jax.experimental import pallas as pl
from jax.experimental.pallas import tpu as pltpu


def _tsm_kernel(x_next_ref, x_prev_ref, x_right_ref, w_ref, b_ref, o_ref,
                shifted_ref, *, fold):
    """Fused temporal-shift + 1x1 conv for one (time, lane-tile) grid step.

    x_next_ref  : (1, fold, L)        channels [0, fold) of frame t+1 (clamped)
    x_prev_ref  : (1, fold, L)        channels [fold, 2*fold) of frame t-1 (clamped)
    x_right_ref : (1, C - 2*fold, L)  channels [2*fold, C) of frame t
    w_ref       : (C, C)              pointwise conv weight (C_out, C_in)
    b_ref       : (C, 1)              pointwise conv bias (f32)
    o_ref       : (1, C, L)
    shifted_ref : (C, L)              VMEM scratch holding the shifted frame
    """
    t = pl.program_id(0)
    num_t = pl.num_programs(0)

    nxt = x_next_ref[0]    # (fold, L)
    prv = x_prev_ref[0]    # (fold, L)

    # Temporal-border zeroing folded into small scalar-predicated selects
    # (only fold rows each, not full-tile masks).
    shifted_ref[0:fold, :] = jnp.where(t == num_t - 1, jnp.zeros_like(nxt), nxt)
    shifted_ref[fold:2 * fold, :] = jnp.where(t == 0, jnp.zeros_like(prv), prv)
    shifted_ref[2 * fold:, :] = x_right_ref[0]

    # net: 1x1 conv == (C_out, C_in) @ (C_in, L) matmul on the MXU, f32 acc.
    out = jnp.dot(w_ref[...], shifted_ref[...],
                  preferred_element_type=jnp.float32)
    o_ref[0] = (out + b_ref[...]).astype(o_ref.dtype)


def _pick_lane_tile(lanes, c, itemsize):
    """Largest lane tile (multiple of 128 dividing `lanes`) within a VMEM budget."""
    # ~5-6 live (C, tile) activation buffers (double-buffered inputs/output +
    # scratch); keep them within ~16 MiB so the call fits comfortably in v7x's
    # 64 MiB physical VMEM (and well under v5e/v6e's 128 MiB).
    cap = (16 * 1024 * 1024) // max(1, 6 * c * itemsize)
    cap = max(128, min(2048, (cap // 128) * 128))
    if lanes <= cap:
        return lanes
    best = None
    t = 128
    while t <= cap:
        if lanes % t == 0:
            best = t
        t += 128
    return best if best is not None else lanes


def temporal_shift_tsm(x, weight, bias, *, num_segments, shift_div=8,
                       compute_dtype=None):
    """TemporalShift forward: shift(x) followed by a 1x1 conv (the wrapped net).

    x      : (N, C, H, W) with N % num_segments == 0
    weight : (C, C)  1x1 conv weight (C_out, C_in)
    bias   : (C,)
    compute_dtype : optional dtype (e.g. jnp.bfloat16) for activations/weight;
        accumulation stays float32.
    """
    n, c, h, w = x.shape
    assert n % num_segments == 0
    B = n // num_segments
    T = num_segments
    HW = h * w
    fold = c // shift_div
    assert 0 < fold and 2 * fold < c, "need 0 < C // shift_div and 2*fold < C"
    lanes = B * HW

    if compute_dtype is not None:
        x = x.astype(compute_dtype)
        weight = weight.astype(compute_dtype)

    itemsize = jnp.dtype(x.dtype).itemsize
    w_itemsize = jnp.dtype(weight.dtype).itemsize

    # Layout plumbing (XLA side): (B*T, C, H, W) -> (T, C, B*HW) so the merged
    # batch*spatial axis is the lane-dense minor dim, and pre-slice the three
    # channel groups so each grid step DMAs only the channels it needs.
    x4 = x.reshape(B, T, c, HW)

    def to_tc(xs):  # (B, T, cc, HW) -> (T, cc, B*HW)
        return jnp.transpose(xs, (1, 2, 0, 3)).reshape(T, xs.shape[2], lanes)

    x_left = to_tc(x4[:, :, :fold, :])            # source of left-shifted chans
    x_mid = to_tc(x4[:, :, fold:2 * fold, :])     # source of right-shifted chans
    x_right = to_tc(x4[:, :, 2 * fold:, :])       # untouched channels
    bias2 = bias.reshape(c, 1).astype(jnp.float32)

    lane_tile = _pick_lane_tile(lanes, c, itemsize)
    grid = (T, lanes // lane_tile)

    x_next_spec = pl.BlockSpec(
        (1, fold, lane_tile),
        lambda t, j: (jnp.minimum(t + 1, T - 1), 0, j))
    x_prev_spec = pl.BlockSpec(
        (1, fold, lane_tile),
        lambda t, j: (jnp.maximum(t - 1, 0), 0, j))
    x_right_spec = pl.BlockSpec((1, c - 2 * fold, lane_tile),
                                lambda t, j: (t, 0, j))
    # Weight/bias block index never changes; for large weights keep a single
    # resident buffer instead of a (pointless) double buffer (saves VMEM on v7x).
    if c * c * w_itemsize >= (2 << 20):
        w_spec = pl.BlockSpec((c, c), lambda t, j: (0, 0),
                              pipeline_mode=pl.Buffered(1))
    else:
        w_spec = pl.BlockSpec((c, c), lambda t, j: (0, 0))
    b_spec = pl.BlockSpec((c, 1), lambda t, j: (0, 0))
    out_spec = pl.BlockSpec((1, c, lane_tile), lambda t, j: (t, 0, j))

    # Explicit VMEM budget (matters on v7x: 64 MiB physical, 32 MiB default).
    est = (5 * c * lane_tile * itemsize            # in/out double buffers + scratch
           + 2 * c * c * w_itemsize + (1 << 16))
    vmem_limit = int(min(48 * 1024 * 1024, max(16 * 1024 * 1024, 2 * est)))

    kernel = functools.partial(_tsm_kernel, fold=fold)

    # TODO(synk): for very large C (>= 1024) add a (tm, tn, tk) matmul tiling
    # grid with an f32 VMEM accumulator instead of the full (C, C) weight.
    out_tc = pl.pallas_call(
        kernel,
        out_shape=jax.ShapeDtypeStruct((T, c, lanes), x.dtype),
        grid_spec=pltpu.PrefetchScalarGridSpec(
            num_scalar_prefetch=0,
            grid=grid,
            in_specs=[x_next_spec, x_prev_spec, x_right_spec, w_spec, b_spec],
            out_specs=out_spec,
            scratch_shapes=[pltpu.VMEM((c, lane_tile), x.dtype)],
        ),
        compiler_params=pltpu.CompilerParams(
            dimension_semantics=("parallel", "parallel"),
            vmem_limit_bytes=vmem_limit),
    )(x_left, x_mid, x_right, weight, bias2)

    # (T, C, B*HW) -> (N, C, H, W)
    out = (out_tc.reshape(T, c, B, HW)
           .transpose(2, 0, 1, 3)
           .reshape(n, c, h, w))
    return out


def _reference(x, weight, bias, *, num_segments, shift_div=8):
    """Pure-JAX reference matching the PyTorch TemporalShift.shift + 1x1 conv."""
    n, c, h, w = x.shape
    xr = x.reshape(-1, num_segments, c, h * w)
    fold = c // shift_div
    left = xr[:, :, :fold, :]
    mid = xr[:, :, fold:2 * fold, :]
    right = xr[:, :, 2 * fold:, :]
    blank_l = jnp.zeros_like(left[:, :1])
    left = jnp.concatenate([left[:, 1:], blank_l], axis=1)
    blank_m = jnp.zeros_like(mid[:, :1])
    mid = jnp.concatenate([blank_m, mid[:, :-1]], axis=1)
    shifted = jnp.concatenate([left, mid, right], axis=2).reshape(n, c, h, w)
    out = jnp.einsum('oc,nchw->nohw', weight, shifted) + bias[None, :, None, None]
    return out


if __name__ == "__main__":
    base_key = jax.random.PRNGKey(0)

    def run_case(case_id, *, num_segments, shift_div, B, C, H, W,
                 compute_dtype=None, atol=1e-4, rtol=1e-4):
        kx, kw, kb = jax.random.split(jax.random.fold_in(base_key, case_id), 3)
        N = B * num_segments
        x = jax.random.normal(kx, (N, C, H, W), dtype=jnp.float32)
        weight = jax.random.normal(kw, (C, C), dtype=jnp.float32) * 0.1
        bias = jax.random.normal(kb, (C,), dtype=jnp.float32) * 0.1

        out = temporal_shift_tsm(x, weight, bias, num_segments=num_segments,
                                 shift_div=shift_div,
                                 compute_dtype=compute_dtype)
        out = jax.block_until_ready(out)

        ref = _reference(x, weight, bias, num_segments=num_segments,
                         shift_div=shift_div)
        assert out.shape == ref.shape == (N, C, H, W)
        out_f32 = out.astype(jnp.float32)
        err = jnp.max(jnp.abs(out_f32 - ref))
        assert jnp.allclose(out_f32, ref, atol=atol, rtol=rtol), (
            f"case {case_id}: max abs err {err}")

    # 1) f32, lane-dense path (B*H*W = 128).
    run_case(1, num_segments=4, shift_div=8, B=2, C=32, H=8, W=8)
    # 2) f32, small/ragged lane path (B*H*W = 32), default num_segments=3.
    run_case(2, num_segments=3, shift_div=8, B=2, C=16, H=4, W=4)
    # 3) bf16 compute path (recommended at real model sizes), f32 accumulation.
    run_case(3, num_segments=4, shift_div=8, B=2, C=32, H=8, W=8,
             compute_dtype=jnp.bfloat16, atol=8e-2, rtol=5e-2)

    print("KERNEL_OK")
</pallas_src>

<mosaic_0001>
module attributes {stable_mosaic.version = 11 : i64} {
  func.func @_tsm_kernel(%arg0: i32, %arg1: i32, %arg2: memref<1x4x128xf32, #tpu.memory_space<vmem>>, %arg3: memref<1x4x128xf32, #tpu.memory_space<vmem>>, %arg4: memref<1x24x128xf32, #tpu.memory_space<vmem>>, %arg5: memref<32x32xf32, #tpu.memory_space<vmem>>, %arg6: memref<32x1xf32, #tpu.memory_space<vmem>>, %arg7: memref<1x32x128xf32, #tpu.memory_space<vmem>>, %arg8: memref<32x128xf32, #tpu.memory_space<vmem>>) attributes {dimension_semantics = [#tpu.dimension_semantics<parallel>, #tpu.dimension_semantics<parallel>], iteration_bounds = array<i64: 4, 1>, scalar_prefetch = 0 : i64, scratch_operands = 1 : i64, tpu.core_type = #tpu.core_type<tc>, window_params = [{transform_indices = @transform_0, window_bounds = array<i64: 1, 4, 128>}, {transform_indices = @transform_1, window_bounds = array<i64: 1, 4, 128>}, {transform_indices = @transform_2, window_bounds = array<i64: 1, 24, 128>}, {pipeline_mode = #tpu.pipeline_mode<synchronous>, transform_indices = @transform_3, window_bounds = array<i64: 32, 32>}, {pipeline_mode = #tpu.pipeline_mode<synchronous>, transform_indices = @transform_4, window_bounds = array<i64: 32, 1>}, {transform_indices = @transform_5, window_bounds = array<i64: 1, 32, 128>}]} {
    %c0 = arith.constant 0 : index
    %c0_0 = arith.constant 0 : index
    %c0_1 = arith.constant 0 : index
    %0 = vector.load %arg2[%c0, %c0_0, %c0_1] : memref<1x4x128xf32, #tpu.memory_space<vmem>>, vector<1x4x128xf32>
    %1 = vector.shape_cast %0 : vector<1x4x128xf32> to vector<4x128xf32>
    %c0_2 = arith.constant 0 : index
    %c0_3 = arith.constant 0 : index
    %c0_4 = arith.constant 0 : index
    %2 = vector.load %arg3[%c0_2, %c0_3, %c0_4] : memref<1x4x128xf32, #tpu.memory_space<vmem>>, vector<1x4x128xf32>
    %3 = vector.shape_cast %2 : vector<1x4x128xf32> to vector<4x128xf32>
    %c3_i32 = arith.constant 3 : i32
    %4 = arith.cmpi eq, %arg0, %c3_i32 : i32
    %cst = arith.constant 0.000000e+00 : f32
    %5 = vector.broadcast %cst : f32 to vector<4x128xf32>
    %6 = arith.select %4, %5, %1 : vector<4x128xf32>
    %c0_5 = arith.constant 0 : index
    %c0_6 = arith.constant 0 : index
    %7 = vector.load %arg8[%c0_5, %c0_6] : memref<32x128xf32, #tpu.memory_space<vmem>>, vector<4x128xf32>
    tpu.vector_store %arg8[%c0_5, %c0_6], %6 {strides = array<i32>} : memref<32x128xf32, #tpu.memory_space<vmem>>, vector<4x128xf32>,
    %c0_i32 = arith.constant 0 : i32
    %8 = arith.cmpi eq, %arg0, %c0_i32 : i32
    %cst_7 = arith.constant 0.000000e+00 : f32
    %9 = vector.broadcast %cst_7 : f32 to vector<4x128xf32>
    %10 = arith.select %8, %9, %3 : vector<4x128xf32>
    %c4 = arith.constant 4 : index
    %c0_8 = arith.constant 0 : index
    %11 = vector.load %arg8[%c4, %c0_8] : memref<32x128xf32, #tpu.memory_space<vmem>>, vector<4x128xf32>
    tpu.vector_store %arg8[%c4, %c0_8], %10 {strides = array<i32>} : memref<32x128xf32, #tpu.memory_space<vmem>>, vector<4x128xf32>,
    %c0_9 = arith.constant 0 : index
    %c0_10 = arith.constant 0 : index
    %c0_11 = arith.constant 0 : index
    %12 = vector.load %arg4[%c0_9, %c0_10, %c0_11] : memref<1x24x128xf32, #tpu.memory_space<vmem>>, vector<1x24x128xf32>
    %13 = vector.shape_cast %12 : vector<1x24x128xf32> to vector<24x128xf32>
    %c8 = arith.constant 8 : index
    %c0_12 = arith.constant 0 : index
    %14 = vector.load %arg8[%c8, %c0_12] : memref<32x128xf32, #tpu.memory_space<vmem>>, vector<24x128xf32>
    tpu.vector_store %arg8[%c8, %c0_12], %13 {strides = array<i32>} : memref<32x128xf32, #tpu.memory_space<vmem>>, vector<24x128xf32>,
    %c0_13 = arith.constant 0 : index
    %c0_14 = arith.constant 0 : index
    %15 = vector.load %arg5[%c0_13, %c0_14] : memref<32x32xf32, #tpu.memory_space<vmem>>, vector<32x32xf32>
    %c0_15 = arith.constant 0 : index
    %c0_16 = arith.constant 0 : index
    %16 = vector.load %arg8[%c0_15, %c0_16] : memref<32x128xf32, #tpu.memory_space<vmem>>, vector<32x128xf32>
    %cst_17 = arith.constant dense<0.000000e+00> : vector<32x128xf32>
    %17 = tpu.matmul %15, %16, %cst_17 {dimension_numbers = #tpu.dot_dimension_numbers<[1], [0], [0], [1], [0, 0, 1, 1], [], []>} : vector<32x32xf32>, vector<32x128xf32>, vector<32x128xf32> -> vector<32x128xf32>
    %c0_18 = arith.constant 0 : index
    %c0_19 = arith.constant 0 : index
    %18 = vector.load %arg6[%c0_18, %c0_19] : memref<32x1xf32, #tpu.memory_space<vmem>>, vector<32x1xf32>
    %19 = vector.broadcast %18 : vector<32x1xf32> to vector<32x128xf32>
    %20 = arith.addf %17, %19 : vector<32x128xf32>
    %c0_20 = arith.constant 0 : index
    %c0_21 = arith.constant 0 : index
    %c0_22 = arith.constant 0 : index
    %21 = vector.load %arg7[%c0_20, %c0_21, %c0_22] : memref<1x32x128xf32, #tpu.memory_space<vmem>>, vector<1x32x128xf32>
    %22 = vector.shape_cast %21 : vector<1x32x128xf32> to vector<32x128xf32>
    %23 = vector.shape_cast %20 : vector<32x128xf32> to vector<1x32x128xf32>
    tpu.vector_store %arg7[%c0_20, %c0_21, %c0_22], %23 {strides = array<i32>} : memref<1x32x128xf32, #tpu.memory_space<vmem>>, vector<1x32x128xf32>,
    return
  }
  func.func @transform_0(%arg0: i32, %arg1: i32) -> (i32, i32, i32) {
    %c1_i32 = arith.constant 1 : i32
    %0 = arith.addi %arg0, %c1_i32 : i32
    %c3_i32 = arith.constant 3 : i32
    %1 = arith.minsi %0, %c3_i32 : i32
    %c0_i32 = arith.constant 0 : i32
    %c0_i32_0 = arith.constant 0 : i32
    return %1, %c0_i32, %arg1 : i32, i32, i32
  }
  func.func @transform_1(%arg0: i32, %arg1: i32) -> (i32, i32, i32) {
    %c1_i32 = arith.constant 1 : i32
    %0 = arith.subi %arg0, %c1_i32 : i32
    %c0_i32 = arith.constant 0 : i32
    %1 = arith.maxsi %0, %c0_i32 : i32
    %c0_i32_0 = arith.constant 0 : i32
    %c0_i32_1 = arith.constant 0 : i32
    return %1, %c0_i32_0, %arg1 : i32, i32, i32
  }
  func.func @transform_2(%arg0: i32, %arg1: i32) -> (i32, i32, i32) {
    %c0_i32 = arith.constant 0 : i32
    %c0_i32_0 = arith.constant 0 : i32
    return %arg0, %c0_i32, %arg1 : i32, i32, i32
  }
  func.func @transform_3(%arg0: i32, %arg1: i32) -> (i32, i32) {
    %c0_i32 = arith.constant 0 : i32
    %c0_i32_0 = arith.constant 0 : i32
    %c0_i32_1 = arith.constant 0 : i32
    return %c0_i32, %c0_i32_0 : i32, i32
  }
  func.func @transform_4(%arg0: i32, %arg1: i32) -> (i32, i32) {
    %c0_i32 = arith.constant 0 : i32
    %c0_i32_0 = arith.constant 0 : i32
    %c0_i32_1 = arith.constant 0 : i32
    return %c0_i32, %c0_i32_0 : i32, i32
  }
  func.func @transform_5(%arg0: i32, %arg1: i32) -> (i32, i32, i32) {
    %c0_i32 = arith.constant 0 : i32
    %c0_i32_0 = arith.constant 0 : i32
    return %arg0, %c0_i32, %arg1 : i32, i32, i32
  }
}

</mosaic_0001>

<bundles_post_ra>
// kernel: tpu_custom_call.1
= control target key start
LH: loop header
LB: loop body
LE: loop exit
PB: predicated region body
PF: predicated region fallthrough
CT: control target
= control target key end

     0   :  { %s1529_s0 = inlined_call_operand.hbm [shape: f32[4,4,128], index: 0, kind: input, shape index: {}]   ;;  %s1530_s1 = inlined_call_operand.hbm [shape: f32[4,4,128], index: 1, kind: input, shape index: {}]   ;;  %s1531_s2 = inlined_call_operand.hbm [shape: f32[4,24,128], index: 2, kind: input, shape index: {}]   ;;  %s1532_s3 = inlined_call_operand.vmem [shape: f32[32,32], index: 3, kind: input, shape index: {}]   ;;  %s1533_s4 = inlined_call_operand.vmem [shape: f32[32,1], index: 4, kind: input, shape index: {}]   ;;  %s1534_s5 = inlined_call_operand.hbm [shape: f32[4,32,128], index: 5, kind: output, shape index: {}]  }
   0x1   :  { %1549 = sst [smem:[#allocation21_spill]] %s1530_s1 }
   0x2   :  { %1550 = sst [smem:[#allocation22_spill]] %s1532_s3 }
   0x3   :  { %1551 = sst [smem:[#allocation23_spill]] %s1533_s4 }
   0x4   :  { %1552 = sst [smem:[#allocation24_spill]] %s1534_s5 }
   0x5   :  { %10 = vsyncpa [#allocation4], 0 }
   0x6   :  { %12 = vsyncpa [#allocation4 + $0x1], 0 }
   0x7   :  { %13 = vsyncpa [#allocation7], 0 }
   0x8   :  { %15 = vsyncpa [#allocation7 + $0x1], 0 }
   0x9   :  { %16 = vsyncpa [#allocation5], 0 }
   0xa   :  { %18 = vsyncpa [#allocation5 + $0x1], 0  ;;  %s1119_s18 = smov 0   ;;  %s1121_s19 = smov 0  }
   0xb   :  { %s1123_s20 = smov 0   ;;  %s1125_s21 = smov 0  }
   0xc   :  { %s1127_s22 = smov 0   ;;  %s1129_s23 = smov 0  }
   0xd   :  { %s1131_s24 = smov 0   ;;  %s1133_s25 = smov 0  }
   0xe   :  { %s1135_s26 = smov 0   ;;  %s1137_s27 = smov 0  }
   0xf   :  { %s1139_s28 = smov 0   ;;  %s1141_s29 = smov 0  }
  0x10 LB: > { %1553 = sst [smem:[#allocation14_spill]] %s1034_s18  ;;  %s1178_s30 = sadd.s32 4294967295, %s1078_s29   ;;  %s1078_s29 = sphi %s1141_s29, %s24_s29   ;;  %s1074_s28 = sphi %s1139_s28, %s1604_s28   ;;  %s1070_s27 = sphi %s1137_s27, %s1603_s27   ;;  %s1066_s26 = sphi %s1135_s26, %s1602_s26   ;;  %s1062_s25 = sphi %s1133_s25, %s1601_s25   ;;  %s1058_s24 = sphi %s1131_s24, %s1600_s24   ;;  %s1054_s23 = sphi %s1129_s23, %s1599_s23   ;;  %s1050_s22 = sphi %s1127_s22, %s1598_s22   ;;  %s1046_s21 = sphi %s1125_s21, %s1597_s21   ;;  %s1042_s20 = sphi %s1123_s20, %s1596_s20   ;;  %s1038_s19 = sphi %s1121_s19, %s1595_s19   ;;  %s1034_s18 = sphi %s1119_s18, %s1594_s18  }
  0x11   : > { %1554 = sst [smem:[#allocation15_spill]] %s1070_s27  ;;  %s661_s6 = sadd.s32 4294967294, %s1078_s29  }
  0x12   : > { %s1182_s7 = sadd.s32 1, %s1074_s28  ;;  %p1542_p0 = scmp.eq.s32.totalorder %s1078_s29, 0 }
  0x13   : > { %p38_p1 = scmp.ge.s32.totalorder %s1182_s7, 4  ;;  %p1541_p2 = scmp.eq.s32.totalorder %s1178_s30, 0 }
  0x14   : > { %s662_s8 = sadd.s32 4294967295, %s1074_s28  ;;  %s85_s9 = sadd.s32 1, %s1054_s23 }
  0x15   : > { %s1190_s10 = scalar_select %p38_p1, 0, %s1182_s7  }
  0x16   : > { %p75_p3 = scmp.gt.s32.totalorder %s662_s8, 0  ;;  %p92_p4 = scmp.ne.s32.totalorder %s1054_s23, %s1050_s22 }
  0x17   : > { %1555 = sst [smem:[#allocation16_spill]] %s1190_s10  ;;  %s663_s11 = sadd.s32 4294967295, %s1190_s10 }
  0x18   : > { %p98_p5 = scmp.ne.s32.totalorder %s1050_s22, %s1046_s21  ;;  %s1606_s8 = smov (!%p75_p3, %s662_s8), 0 }
  0x19   : > { %p78_p6 = scmp.gt.s32.totalorder %s663_s11, 0  ;;  %p1198_p7 = por %p92_p4, %p1542_p0 }
  0x1a   : > { %p1204_p8 = por %p98_p5, %p1541_p2  ;;  %s108_s14 = ssub.s32 %s1074_s28, %s1190_s10 }
  0x1b   : > { %s1608_s11 = smov (!%p78_p6, %s663_s11), 0  ;;  %p111_p9 = scmp.eq.s32.totalorder %s108_s14, 0 }
  0x1c   : > { %s1557_s13 = scalar_select %p1204_p8, 1, 0 }
  0x1d   : > { %s113_s15 = sadd.s32 1, %s1042_s20  ;;  %s80_s16 = ssub.s32 %s1606_s8, %s1608_s11 }
  0x1e   : > { %p120_p10 = scmp.ne.s32.totalorder %s1042_s20, %s1038_s19  ;;  %p83_p11 = scmp.eq.s32.totalorder %s80_s16, 0 }
  0x1f   : > { %p126_p12 = scmp.ne.s32.totalorder %s1038_s19, %s1034_s18  ;;  %p194_p3 = scmp.eq.s32.totalorder %s1178_s30, 3 }
  0x20   : > { %s1216_s17 = scalar_select %p111_p9, %s1042_s20, %s113_s15  }
  0x21   : > { %s1219_s21 = scalar_select %p83_p11, %s1054_s23, %s85_s9  }
  0x22   : > { %1558 = sst [smem:[#allocation17_spill]] %s1216_s17  ;;  %p1223_p13 = por %p120_p10, %p1542_p0 }
  0x23   : > { %1559 = sst [smem:[#allocation18_spill]] %s1219_s21  ;;  %p1229_p1 = por %p126_p12, %p1541_p2 }
  0x24   : > { %p200_p4 = scmp.eq.s32.totalorder %s661_s6, 3  ;;  %p1543_p5 = scmp.lt.s32.totalorder %s1078_s29, 4 }
  0x25   : > { %s1561_s14 = scalar_select %p1229_p1, 1, 0 }
  0x26   : > { %p1235_p6 = por %p194_p3, %p120_p10  ;;  %p1239_p9 = por %p200_p4, %p126_p12 }
  0x27   : > { %s248_s15 = sand.u32 1, %s1078_s29   ;;  %s250_s16 = sand.u32 1, %s1054_s23  }
  0x28   : > { %s1562_s9 = scalar_select %p1235_p6, 1, 0 }
  0x29   : > { %s1563_s11 = scalar_select %p1239_p9, 1, 0 }
  0x2a   : > { %s668_s21 = sshll.u32 %s250_s16, 2  ;;  %s670_s17 = sshll.u32 %s1606_s8, 6 }
  0x2b   : > { %1564 = sst [smem:[#allocation19_spill]] %s1563_s11  ;;  %s1565_s1 = sld [smem:[#allocation21_spill]] }
  0x2c   : > { %s252_s6 = scalar_lea.vmem [#allocation6], %s668_s21  ;;  %p1256_p10 = pnand %p1543_p5, %p1198_p7 }
  0x2d   : > { %s263_s27 = sshll.u32 %s252_s6, 4  ;;  %p1264_p11 = pnand %p1543_p5, %p1223_p13  ;;  %s1250_s27 = int_to_ptr.vmem [resolvable:$true] %s263_s27 }
  0x2e   : > { %s1270_s18 = scalar_lea.sflag [#allocation7], %s248_s15  ;;  %p852_p2 = pneg %p1256_p10 }
  0x31   : > { %s1248_s3 = scalar_lea.hbm %s1565_s1, %s670_s17  ;;  %s855_s17 = scalar_lea.hbm %s1565_s1, 256 }
  0x32   : > { %s850_s8 = scalar_lea.hbm %s1248_s3, 64  ;;  %p856_p13 = scmp.lt.u32.totalorder %s1248_s3, %s1565_s1 }
  0x33   : > { %p851_p4 = scmp.ne.s32.totalorder %s1248_s3, %s850_s8  ;;  %p857_p5 = scmp.lt.u32.totalorder %s855_s17, %s850_s8 }
  0x34   : > { %p859_p3 = scmp.lt.u32.totalorder %s850_s8, %s1248_s3 }
  0x35   : > { %p853_p7 = pnand %p852_p2, %p851_p4  ;;  %p858_p12 = por %p857_p5, %p856_p13 }
  0x37   : > { %p854_p0 = pneg %p853_p7  ;;  %p860_p9 = por %p859_p3, %p858_p12 }
  0x39   : > { %p861_p6 = pnand %p860_p9, %p854_p0 }
  0x3b   : > { %864 = shalt.err (!%p861_p6)
}
  0x3c   : > { %s865_s15 = scalar_lea.vmem %s1250_s27, 64  ;;  %s1080_s6 = smov [#allocation6]  }
  0x3d   : > { %p866_p4 = scmp.ne.s32.totalorder %s1250_s27, %s865_s15  ;;  %s870_s5 = sshll.u32 %s1080_s6, 4  ;;  %s871_s5 = int_to_ptr.vmem [resolvable:$false] %s870_s5 }
  0x3e   : > { %s872_s12 = scalar_lea.vmem %s871_s5, 128  ;;  %p873_p8 = scmp.lt.s32.totalorder %s1250_s27, %s871_s5 }
  0x3f   : > { %p868_p7 = pnand %p866_p4, %p852_p2  ;;  %p874_p5 = scmp.lt.s32.totalorder %s872_s12, %s865_s15 }
  0x41   : > { %p869_p1 = pneg %p868_p7  ;;  %p875_p13 = por %p874_p5, %p873_p8 }
  0x43   : > { %p876_p12 = pnand %p875_p13, %p869_p1 }
  0x45   : > { %879 = shalt.err (!%p876_p12)
}
  0x46   : > { %737 = dma.hbm_to_vmem [thread:$0]  (!%p1256_p10), %s1248_s3, 64, %s1250_s27, %s1270_s18  }
  0x47   : > { %p1568_p0 = scmp.lt.s32.totalorder %s1078_s29, 5  ;;  %p1569_p2 = scmp.ge.s32.totalorder %s1078_s29, 1 }
  0x48   : > { %p41_p1 = scmp.lt.s32.totalorder %s1182_s7, 3  ;;  %s43_s8 = sadd.s32 1, %s1190_s10 }
  0x49   : > { %p1302_p8 = pnand %p1569_p2, %p1568_p0  ;;  %p44_p6 = scmp.lt.s32.totalorder %s43_s8, 3 }
  0x4a   : > { %s51_s17 = sadd.s32 1, %s1066_s26  ;;  %s1610_s7 = smov (!%p41_p1, %s1182_s7), 3 }
  0x4b   : > { %s1570_s11 = scalar_select %p1302_p8, 1, 0 }
  0x4c   : > { %s1612_s8 = smov (!%p44_p6, %s43_s8), 3  ;;  %p58_p9 = scmp.ne.s32.totalorder %s1066_s26, %s1062_s25 }
  0x4d   : > { %p64_p3 = scmp.ne.s32.totalorder %s1062_s25, %s1058_s24  ;;  %s46_s21 = ssub.s32 %s1610_s7, %s1612_s8 }
  0x4e   : > { %s226_s16 = sand.u32 1, %s1066_s26   ;;  %p49_p4 = scmp.eq.s32.totalorder %s46_s21, 0 }
  0x4f   : > { %p1571_p10 = scmp.eq.s32.totalorder %s1078_s29, 0  ;;  %p1572_p5 = scmp.eq.s32.totalorder %s1178_s30, 0 }
  0x50   : > { %s1324_s27 = scalar_select %p49_p4, %s1066_s26, %s51_s17  }
  0x51   : > { %p60_p7 = por %p1571_p10, %p58_p9  ;;  %p1319_p13 = por %p1572_p5, %p64_p3 }
  0x52   : > { %1574 = sst [smem:[#allocation20_spill]] %s1324_s27  ;;  %s666_s15 = sshll.u32 %s226_s16, 2 }
  0x53   : > { %s1573_s3 = scalar_select %p1319_p13, 1, 0 }
  0x54   : > { %s667_s6 = sshll.u32 %s1610_s7, 6  ;;  %s230_s24 = scalar_lea.vmem [#allocation3], %s666_s15 }
  0x55   : > { %s1329_s1 = scalar_lea.hbm %s1529_s0, %s667_s6  ;;  %s241_s8 = sshll.u32 %s230_s24, 4  ;;  %s1337_s8 = int_to_ptr.vmem [resolvable:$true] %s241_s8 }
  0x56   : > { %p1575_p12 = scmp.lt.s32.totalorder %s1078_s29, 4  ;;  %s272_s7 = sand.u32 1, %s1042_s20  }
  0x57   : > { %s1340_s17 = smul.u32 24, %s272_s7  ;;  %s227_s6 = scalar_lea.sflag [#allocation4], %s226_s16 }
  0x58   : > { %p1333_p0 = pnand %p1575_p12, %p60_p7  ;;  %s880_s5 = scalar_lea.hbm %s1329_s1, 64 }
  0x59   : > { %p881_p2 = scmp.ne.s32.totalorder %s1329_s1, %s880_s5  ;;  %s885_s24 = scalar_lea.hbm %s1529_s0, 256 }
  0x5a   : > { %p882_p1 = pneg %p1333_p0  ;;  %p886_p3 = scmp.lt.u32.totalorder %s1329_s1, %s1529_s0 }
  0x5b   : > { %p887_p4 = scmp.lt.u32.totalorder %s885_s24, %s880_s5  ;;  %p889_p7 = scmp.lt.u32.totalorder %s880_s5, %s1329_s1 }
  0x5c   : > { %p883_p6 = pnand %p882_p1, %p881_p2 }
  0x5d   : > { %p888_p10 = por %p887_p4, %p886_p3 }
  0x5e   : > { %p884_p9 = pneg %p883_p6 }
  0x5f   : > { %p890_p5 = por %p889_p7, %p888_p10 }
  0x61   : > { %p891_p12 = pnand %p890_p5, %p884_p9 }
  0x63   : > { %894 = shalt.err (!%p891_p12)
}
  0x64   : > { %s895_s16 = scalar_lea.vmem %s1337_s8, 64  ;;  %s1081_s7 = smov [#allocation3]  }
  0x65   : > { %p896_p2 = scmp.ne.s32.totalorder %s1337_s8, %s895_s16  ;;  %s900_s15 = sshll.u32 %s1081_s7, 4  ;;  %s901_s15 = int_to_ptr.vmem [resolvable:$false] %s900_s15 }
  0x66   : > { %s902_s10 = scalar_lea.vmem %s901_s15, 128  ;;  %p903_p8 = scmp.lt.s32.totalorder %s1337_s8, %s901_s15 }
  0x67   : > { %p898_p6 = pnand %p896_p2, %p882_p1  ;;  %p904_p3 = scmp.lt.s32.totalorder %s902_s10, %s895_s16 }
  0x69   : > { %p899_p13 = pneg %p898_p6  ;;  %p905_p4 = por %p904_p3, %p903_p8 }
  0x6b   : > { %p906_p10 = pnand %p905_p4, %p899_p13 }
  0x6d   : > { %909 = shalt.err (!%p906_p10)
}
  0x6e   : > { %734 = dma.hbm_to_vmem [thread:$0]  (!%p1333_p0), %s1329_s1, 64, %s1337_s8, %s227_s6  }
  0x6f   : > { %s721_s27 = smul.u32 384, %s1074_s28  ;;  %s274_s5 = scalar_lea.vmem [#allocation8], %s1340_s17 }
  0x70   : > { %s282_s12 = sshll.u32 %s274_s5, 4  ;;  %p912_p13 = pneg %p1264_p11  ;;  %s1374_s12 = int_to_ptr.vmem [resolvable:$true] %s282_s12 }
  0x71   : > { %s1372_s15 = scalar_lea.hbm %s1531_s2, %s721_s27  ;;  %s915_s17 = scalar_lea.hbm %s1531_s2, 1536 }
  0x72   : > { %s910_s21 = scalar_lea.hbm %s1372_s15, 384  ;;  %p916_p9 = scmp.lt.u32.totalorder %s1372_s15, %s1531_s2 }
  0x73   : > { %p911_p8 = scmp.ne.s32.totalorder %s1372_s15, %s910_s21  ;;  %p917_p7 = scmp.lt.u32.totalorder %s915_s17, %s910_s21 }
  0x74   : > { %p919_p12 = scmp.lt.u32.totalorder %s910_s21, %s1372_s15 }
  0x75   : > { %p913_p0 = pnand %p912_p13, %p911_p8  ;;  %p918_p5 = por %p917_p7, %p916_p9 }
  0x77   : > { %p914_p1 = pneg %p913_p0  ;;  %p920_p2 = por %p919_p12, %p918_p5 }
  0x79   : > { %p921_p6 = pnand %p920_p2, %p914_p1 }
  0x7b   : > { %924 = shalt.err (!%p921_p6)
}
  0x7c   : > { %s925_s10 = scalar_lea.vmem %s1374_s12, 384  ;;  %s1082_s27 = smov [#allocation8]  }
  0x7d   : > { %p926_p3 = scmp.ne.s32.totalorder %s1374_s12, %s925_s10  ;;  %s930_s5 = sshll.u32 %s1082_s27, 4  ;;  %s931_s5 = int_to_ptr.vmem [resolvable:$false] %s930_s5 }
  0x7e   : > { %s932_s24 = scalar_lea.vmem %s931_s5, 768  ;;  %p933_p8 = scmp.lt.s32.totalorder %s1374_s12, %s931_s5 }
  0x7f   : > { %p928_p4 = pnand %p926_p3, %p912_p13  ;;  %p934_p0 = scmp.lt.s32.totalorder %s932_s24, %s925_s10 }
  0x81   : > { %p929_p10 = pneg %p928_p4  ;;  %p935_p9 = por %p934_p0, %p933_p8 }
  0x83   : > { %p936_p7 = pnand %p935_p9, %p929_p10 }
  0x85   : > { %939 = shalt.err (!%p936_p7)
}
  0x86   : > { %s1083_s7 = smov 128   ;;  %s1084_s21 = smov 8  }
  0x87   : > { %740 = dma.hbm_to_vmem [thread:$0]  (!%p1264_p11), %s1372_s15, 384, %s1374_s12, %s1270_s18, %s1083_s7, %s1083_s7, %s1084_s21  }
  0x88   : > { %p1577_p13 = scmp.ne.s32.totalorder %s1570_s11, 0 }
  0x89   : > { %s296_s1 = sand.u32 (!%p1577_p13), 1, %s1062_s25   ;;  %p1578_p1 = scmp.ne.s32.totalorder (!%p1577_p13), %s1573_s3, 0 }
  0x8a   : > { %294 = sbr.rel (%p1577_p13) target bundleno = 418 (0x1a2), region = 40  ;;  %s1405_s8 = sshll.u32 (!%p1577_p13), %s296_s1, 2 }
  0x8b   : > { %s297_s17 = scalar_lea.sflag (!%p1577_p13), [#allocation4], %s296_s1  ;;  %s300_s6 = scalar_lea.vmem (!%p1577_p13), [#allocation3], %s1405_s8 }
  0x91   : > { %1017 = dma.done.wait (%p1578_p1), %s297_s17, 64  }
  0x92   : > { %1019 = vsyncadd (%p1578_p1), %s297_s17, 4294967232  ;;  %s305_s4 = sand.u32 1, %s1178_s30   ;;  %s307_s18 = sand.u32 1, %s1050_s22  }
  0x93   : > { %s674_s11 = sshll.u32 %s307_s18, 2  ;;  %s306_s12 = scalar_lea.sflag [#allocation7], %s305_s4 }
  0x94   : > { %s309_s15 = scalar_lea.vmem [#allocation6], %s674_s11  ;;  %p1579_p11 = scmp.ne.s32.totalorder %s1557_s13, 0 }
  0x96   : > { %1021 = dma.done.wait (%p1579_p11), %s306_s12, 64  }
  0x97   : > { %1023 = vsyncadd (%p1579_p11), %s306_s12, 4294967232  ;;  %s1419_s16 = sand.u32 1, %s1038_s19   ;;  %p1580_p5 = scmp.ne.s32.totalorder %s1561_s14, 0 }
  0x98   : > { %s722_s3 = smul.u32 24, %s1419_s16 }
  0x9a   : > { %s318_s10 = scalar_lea.vmem [#allocation8], %s722_s3 }
  0x9b   : > { %1025 = dma.done.wait (%p1580_p5), %s306_s12, 384  }
  0x9c   : > { %1027 = vsyncadd (%p1580_p5), %s306_s12, 4294966912  ;;  %s1581_s30 = sld [smem:[#allocation15_spill]]  ;;  %v1085_v0 = vmov 0   ;;  %vm413_vm2 = vcmask 261120   ;;  %v361_v3 = vld [vmem:[%s300_s6] sm:$0xf] }
  0x9d   : > { %849 = vset.pattern.permute.xlu1 %v1085_v0  ;;  %848 = vset.pattern.permute.xlu0 %v1085_v0  ;;  %v362_v4 = vld [vmem:[%s309_s15] sm:$0xf]  ;;  %v376_v8 = vld [vmem:[%s318_s10 + $0x8] sm:$0xff]  ;;  %v377_v9 = vld [vmem:[%s318_s10 + $0x10] sm:$0xff]  ;;  %s1582_s24 = sld [smem:[#allocation22_spill]]  ;;  %s1584_s6 = sld [smem:[#allocation23_spill]] }
  0x9e   : > { %v375_v5 = vld [vmem:[%s318_s10] sm:$0xff]  ;;  %v712_v18 = vpack.c.bf16 %v377_v9, %v376_v8  ;;  %s675_s5 = sshll.u32 %s1419_s16, 5  ;;  %s1585_s4 = sld [smem:[#allocation24_spill]] }
  0x9f   : > { %p1586_p3 = scmp.ne.s32.totalorder %s1562_s9, 0  ;;  %s1086_s12 = smov [#allocation9]  }
  0xa0   : > { %s944_s15 = sshll.u32 %s1086_s12, 4  ;;  %s945_s15 = int_to_ptr.vmem [resolvable:$false] %s944_s15 }
  0xa1   : > { %s946_s3 = scalar_lea.vmem %s945_s15, 1024 }
  0xa2   : > { %p363_p12 = scmp.eq.s32.totalorder %s1581_s30, 3  ;;  %p369_p2 = scmp.eq.s32.totalorder %s1581_s30, 0 }
  0xa3   : > { %s1583_s7 = smov %s1582_s24  ;;  %v381_v10 = vld [vmem:[%s1582_s24] sm:$0xff]  ;;  %v391_v12 = vld [vmem:[%s1584_s6 + $0x10] sm:$0xff]  ;;  %v392_v14 = vld [vmem:[%s1584_s6 + $0x18] sm:$0xff]  ;;  %s354_s24 = scalar_lea.vmem [#allocation9], %s675_s5 }
  0xa4   : > { %s364_s13 = scalar_select %p363_p12, 1, 0  ;;  %702 = vmatprep.mubr.msk.f32.mxu0 %vm413_vm2, %v381_v10  ;;  %v383_v11 = vld [vmem:[%s1583_s7 + $0x10] sm:$0xff]  ;;  %v389_v13 = vld [vmem:[%s1584_s6] sm:$0xff]  ;;  %405 = vperm.xlu1 %849, %v391_v12   ;;  %v390_v15 = vld [vmem:[%s1584_s6 + $0x8] sm:$0xff] }
  0xa5   : > { %s370_s27 = scalar_select %p369_p2, 1, 0  ;;  %705 = vmatprep.mubr.msk.f32.mxu1 %vm413_vm2, %v383_v11  ;;  %395 = vperm.xlu0 %848, %v389_v13   ;;  %v382_v19 = vld [vmem:[%s1583_s7 + $0x8] sm:$0xff]  ;;  %v384_v20 = vld [vmem:[%s1583_s7 + $0x18] sm:$0xff] }
  0xa6   : > { %v365_v1 = vstv %s364_s13  ;;  %s530_s21 = sshll.u32 %s354_s24, 4  ;;  %s685_s1 = sshll.u32 %s1581_s30, 9  ;;  %s1458_s21 = int_to_ptr.vmem [resolvable:$true] %s530_s21 }
  0xa7   : > { %vm366_vm0 = vcmp.eq.s32.totalorder %v365_v1, 1  ;;  %v371_v2 = vstv %s370_s27  ;;  %s1463_s18 = scalar_lea.hbm %s1585_s4, %s685_s1  ;;  %s516_s30 = scalar_lea.sflag [#allocation5], %s1419_s16 }
  0xa8   : > { %vm372_vm1 = vcmp.eq.s32.totalorder %v371_v2, 1  ;;  %v367_v6 = vsel %vm366_vm0, 0.0, %v361_v3  ;;  %410 = vperm.xlu1 %849, %v392_v14   ;;  %s940_s11 = scalar_lea.vmem %s1458_s21, 512  ;;  %p947_p8 = scmp.lt.s32.totalorder %s1458_s21, %s945_s15 }
  0xa9   : > { %v373_v7 = vsel %vm372_vm1, 0.0, %v362_v4  ;;  %368 = vst [vmem:[#allocation2] sm:$0xf] %v367_v6  ;;  %400 = vperm.xlu0 %848, %v390_v15   ;;  %p941_p6 = scmp.ne.s32.totalorder %s1458_s21, %s940_s11  ;;  %p948_p0 = scmp.lt.s32.totalorder %s946_s3, %s940_s11 }
  0xaa   : > { %374 = vst [vmem:[#allocation2 + $0x4] sm:$0xf] %v373_v7 }
  0xab   : > { %p942_p4 = pnand %p941_p6, %p1586_p3  ;;  %p949_p9 = por %p948_p0, %p947_p8 }
  0xad   : > { %p943_p10 = pneg %p942_p4 }
  0xaf   : > { %p950_p7 = pnand %p949_p9, %p943_p10 }
  0xb1   : > { %v385_v16 = vld [vmem:[#allocation2] sm:$0xff] }
  0xb2   : > { %v708_v17 = vpack.c.bf16 %v375_v5, %v385_v16 }
  0xb4   : > { %709 = vmatprep.subr.bf16.mxu0 %v708_v17  ;;  %716 = vmatprep.subr.bf16.mxu1 %v708_v17 }
  0xb5   : > { %711 = vmatpush3.bf16.msra.mxu0 %v708_v17  ;;  %718 = vmatpush3.bf16.msra.mxu1 %v708_v17 }
  0xb6   : > { %713 = vmatprep.subr.bf16.mxu0 %v712_v18  ;;  %717 = vmatprep.subr.bf16.mxu1 %v712_v18 }
  0xb9   : > { %715 = vmatpush3.bf16.msra.mxu0 %v712_v18  ;;  %719 = vmatpush3.bf16.msra.mxu1 %v712_v18 }
  0xbc   : > { %703 = vmatmul.mubr.msk.f32.vlgmr.msra.gmra.mrb[0].mxu0 %vm413_vm2, %v382_v19  ;;  %706 = vmatmul.mubr.msk.f32.vlgmr.msra.gmra.mrb[0].mxu1 %vm413_vm2, %v384_v20 }
 0x123   : > { %v406_v21 = vpop.permute.xlu1 %405 }
 0x124   : > { %v396_v22 = vpop.permute.xlu0 %395 }
 0x127   : > { %v411_v23 = vpop.permute.xlu1 %410 }
 0x128   : > { %v401_v24 = vpop.permute.xlu0 %400 }
 0x18f   : > { %v704_v25 = vpop.f32.mrb[0].mxu0  ;;  %v707_v26 = vpop.f32.mrb[0].mxu1 }
 0x190   : > { %v498_v27 = vadd.f32 %v704_v25, %v401_v24  ;;  %v508_v28 = vadd.f32 %v707_v26, %v411_v23  ;;  %v492_v29 = vpop.f32.mrb[1].mxu0  ;;  %v502_v30 = vpop.f32.mrb[1].mxu1 }
 0x191   : > { %v493_v31 = vadd.f32 %v492_v29, %v396_v22  ;;  %v503_v32 = vadd.f32 %v502_v30, %v406_v21 }
 0x192   : > { %512 = vst [vmem:[%s354_s24 + $0x8] sm:$0xff] %v498_v27  ;;  %514 = vst [vmem:[%s354_s24 + $0x18] sm:$0xff] %v508_v28 }
 0x193   : > { %511 = vst [vmem:[%s354_s24] sm:$0xff] %v493_v31  ;;  %513 = vst [vmem:[%s354_s24 + $0x10] sm:$0xff] %v503_v32 }
 0x194   : > { %953 = shalt.err (!%p950_p7)
}
 0x195   : > { %s954_s10 = scalar_lea.hbm %s1463_s18, 512  ;;  %s958_s14 = scalar_lea.hbm %s1585_s4, 2048 }
 0x196   : > { %p955_p13 = scmp.ne.s32.totalorder %s1463_s18, %s954_s10  ;;  %p959_p5 = scmp.lt.u32.totalorder %s1463_s18, %s1585_s4 }
 0x197   : > { %p960_p12 = scmp.lt.u32.totalorder %s958_s14, %s954_s10  ;;  %p962_p6 = scmp.lt.u32.totalorder %s954_s10, %s1463_s18 }
 0x198   : > { %p956_p1 = pnand %p955_p13, %p1586_p3 }
 0x199   : > { %p961_p2 = por %p960_p12, %p959_p5 }
 0x19a   : > { %p957_p11 = pneg %p956_p1 }
 0x19b   : > { %p963_p4 = por %p962_p6, %p961_p2 }
 0x19d   : > { %p964_p10 = pnand %p963_p4, %p957_p11 }
 0x19f   : > { %967 = shalt.err (!%p964_p10)
}
 0x1a0   : > { %s1087_s1 = smov 128   ;;  %s1088_s8 = smov 8  }
 0x1a1   : > { %729 = dma.vmem_to_hbm [thread:$0]  (%p1586_p3), %s1458_s21, 512, %s1463_s18, %s516_s30, %s1087_s1, %s1087_s1, %s1088_s8  }
 0x1a2 PF: > { %s1587_s17 = sld [smem:[#allocation14_spill]]  ;;  %s1588_s11 = sld [smem:[#allocation19_spill]] }
 0x1a3   : > { %p746_p8 = scmp.ge.s32.totalorder %s1078_s29, 2 }
 0x1a8   : > { %s545_s12 = sand.u32 1, %s1587_s17   ;;  %p1589_p0 = scmp.ne.s32.totalorder %s1588_s11, 0 }
 0x1a9   : > { %s546_s15 = scalar_lea.sflag [#allocation5], %s545_s12 }
 0x1aa   : > { %p742_p9 = pnand %p746_p8, %p1589_p0 }
 0x1ac   : > { %1029 = dma.done.wait (!%p742_p9), %s546_s15, 512  }
 0x1ad   : > { %1031 = vsyncadd (!%p742_p9), %s546_s15, 4294966784  ;;  %s24_s29 = sadd.s32 1, %s1078_s29   ;;  %s1590_s3 = sld [smem:[#allocation17_spill]] }
 0x1ae   : > { %p21_p7 = scmp.ge.s32.totalorder %s24_s29, 6   ;;  %s1591_s9 = sld [smem:[#allocation18_spill]] }
 0x1af   : > { %s1592_s16 = sld [smem:[#allocation20_spill]]  ;;  %s1593_s30 = sld [smem:[#allocation16_spill]] }
 0x1b0   : > { %s1594_s18 = smov %s1038_s19  ;;  %s1595_s19 = smov %s1042_s20 }
 0x1b1   : > { %s1597_s21 = smov %s1050_s22  ;;  %s1598_s22 = smov %s1054_s23 }
 0x1b2   : > { %s1600_s24 = smov %s1062_s25  ;;  %s1601_s25 = smov %s1066_s26 }
 0x1b3   : > { %s1596_s20 = smov %s1590_s3  ;;  %s1603_s27 = smov %s1074_s28 }
 0x1b4   : > { %s1599_s23 = smov %s1591_s9  ;;  %23 = sbr.rel (!%p21_p7) target bundleno = 16 (0x10), region = 109 }
 0x1b5   : > { %s1602_s26 = smov %s1592_s16  ;;  %s1604_s28 = smov %s1593_s30 }
 0x1bb   :  { %551 = vsyncpa [#allocation4], 1 }
 0x1bc   :  { %553 = vsyncpa [#allocation4 + $0x1], 1 }
 0x1bd   :  { %554 = vsyncpa [#allocation7], 1 }
 0x1be   :  { %556 = vsyncpa [#allocation7 + $0x1], 1 }
 0x1bf   :  { %557 = vsyncpa [#allocation5], 1 }
 0x1c0   :  { %559 = vsyncpa [#allocation5 + $0x1], 1 }

</bundles_post_ra>
